<compile_context>
chip_gen: v6e
topology: v6e:2x2x1
jax: 0.10.0
libtpu: 0.0.40
codegen_flags: <defaults>
</compile_context>

<pallas_src>
import functools

import jax
import jax.numpy as jnp
from jax import lax
from jax.experimental import pallas as pl
from jax.experimental.pallas import tpu as pltpu


LANE = 128  # pad feature dims to a full lane width


def _round_up(n, m):
    return ((n + m - 1) // m) * m


# ----------------------------------------------------------------------------
# Fused kernel: encoder + projector (both views) + BN cross-correlation loss.
# Scalars are written to an SMEM output of shape (4,).
# ----------------------------------------------------------------------------
def _fused_barlow_kernel(x_ref, w1_ref, b1_ref, w2_ref, b2_ref, w3_ref, b3_ref,
                         out_ref, *, lamb, batch, proj_dim, eps):
    f32 = jnp.float32

    # ---- encoder: Linear + ReLU on the batched (2B, Din) slab ---------------
    h = jnp.dot(x_ref[...], w1_ref[...], preferred_element_type=f32) + b1_ref[...]
    h = jnp.maximum(h, 0.0)

    # ---- projector[0]: Linear + ReLU ----------------------------------------
    h = jnp.dot(h.astype(jnp.bfloat16), w2_ref[...],
                preferred_element_type=f32) + b2_ref[...]
    h = jnp.maximum(h, 0.0)

    # ---- projector[-1]: Linear ----------------------------------------------
    z = jnp.dot(h.astype(jnp.bfloat16), w3_ref[...],
                preferred_element_type=f32) + b3_ref[...]

    z1 = z[:batch, :]      # view 1
    z2 = z[batch:, :]      # view 2

    # ---- per-view BatchNorm1d(affine=False), training semantics -------------
    # batch mean, biased variance, eps=1e-5.  The c /= batch_size of the
    # reference is folded into the z1 normalization scale (exact same math).
    def bn(zv, scale):
        m = jnp.mean(zv, axis=0, keepdims=True)
        d = zv - m
        v = jnp.mean(d * d, axis=0, keepdims=True)     # biased variance
        return d * (lax.rsqrt(v + eps) * scale)

    z1n = bn(z1, 1.0 / batch)
    z2n = bn(z2, 1.0)

    # c = bn(z1).T @ bn(z2) / batch_size   (scale already folded into z1n)
    c = lax.dot_general(
        z1n, z2n,
        dimension_numbers=(((0,), (0,)), ((), ())),
        preferred_element_type=f32,
    )

    P = c.shape[0]  # padded (lane-dense) projection width
    row = lax.broadcasted_iota(jnp.int32, (P, P), 0)
    col = lax.broadcasted_iota(jnp.int32, (P, P), 1)
    valid = (row < proj_dim) & (col < proj_dim)        # drop zero-padded lanes
    is_diag = row == col

    on_diag = jnp.sum(jnp.where(valid & is_diag, (c - 1.0) * (c - 1.0), 0.0))
    off_diag = jnp.sum(jnp.where(valid & jnp.logical_not(is_diag), c * c, 0.0))

    loss = on_diag + lamb * off_diag
    loss_norm = ((1.0 - lamb) / proj_dim) * on_diag + \
                (lamb / (proj_dim * proj_dim - proj_dim)) * off_diag

    out_ref[0] = loss
    out_ref[1] = loss_norm
    out_ref[2] = on_diag
    out_ref[3] = off_diag


# ----------------------------------------------------------------------------
# Parameters: logical dims 64 / 64 / 32, zero-padded to 128 lanes, bf16 weights.
# ----------------------------------------------------------------------------
def init_params(key, in_features, enc_dim=64, proj_hidden=64, proj_dim=32):
    ks = jax.random.split(key, 6)
    scale = 0.02

    def pad_to(a, rows, cols):
        out = jnp.zeros((rows, cols), a.dtype)
        return out.at[:a.shape[0], :a.shape[1]].set(a)

    ep = _round_up(enc_dim, LANE)
    hp = _round_up(proj_hidden, LANE)
    pp = _round_up(proj_dim, LANE)

    enc_w = scale * jax.random.normal(ks[0], (in_features, enc_dim), jnp.float32)
    enc_b = scale * jax.random.normal(ks[1], (1, enc_dim), jnp.float32)
    p1_w = scale * jax.random.normal(ks[2], (enc_dim, proj_hidden), jnp.float32)
    p1_b = scale * jax.random.normal(ks[3], (1, proj_hidden), jnp.float32)
    p2_w = scale * jax.random.normal(ks[4], (proj_hidden, proj_dim), jnp.float32)
    p2_b = scale * jax.random.normal(ks[5], (1, proj_dim), jnp.float32)

    return {
        # bf16 weights for the MXU (f32 accumulation); zero-padded columns/rows
        # keep every tile lane-dense and contribute exactly zero downstream.
        'enc_w': pad_to(enc_w, in_features, ep).astype(jnp.bfloat16),
        'enc_b': pad_to(enc_b, 1, ep),                 # biases stay f32 (VPU)
        'p1_w': pad_to(p1_w, ep, hp).astype(jnp.bfloat16),
        'p1_b': pad_to(p1_b, 1, hp),
        'p2_w': pad_to(p2_w, hp, pp).astype(jnp.bfloat16),
        'p2_b': pad_to(p2_b, 1, pp),
        'proj_dim': proj_dim,                          # logical (unpadded) D
    }


# ----------------------------------------------------------------------------
# Forward: one pallas_call for the whole model.
# ----------------------------------------------------------------------------
def barlow_twins_forward(params, x1, x2, *, lamb, batch_size):
    assert x1.shape == x2.shape
    B = x1.shape[0]
    assert batch_size == B, "batch_size must equal the leading dim of x1/x2"
    D = int(params['proj_dim'])

    # glue: batch both views (2B, Din), flatten NCHW row-major, bf16 for MXU.
    x = jnp.concatenate([x1, x2], axis=0).reshape(2 * B, -1).astype(jnp.bfloat16)

    vmem = pl.BlockSpec(memory_space=pltpu.MemorySpace.VMEM)
    out = pl.pallas_call(
        functools.partial(_fused_barlow_kernel, lamb=float(lamb),
                          batch=int(B), proj_dim=D, eps=1e-5),
        out_shape=jax.ShapeDtypeStruct((4,), jnp.float32),
        in_specs=[vmem] * 7,
        out_specs=pl.BlockSpec(memory_space=pltpu.MemorySpace.SMEM),
    )(x, params['enc_w'], params['enc_b'],
      params['p1_w'], params['p1_b'],
      params['p2_w'], params['p2_b'])

    return {'loss': out[0], 'loss_norm': out[1],
            'on_diag': out[2], 'off_diag': out[3]}


if __name__ == "__main__":
    B, C, H, W = 8, 4, 16, 16
    lamb = 0.005

    key = jax.random.PRNGKey(0)
    k_x1, k_x2, k_p = jax.random.split(key, 3)
    x1 = jax.random.normal(k_x1, (B, C, H, W), jnp.float32)
    x2 = jax.random.normal(k_x2, (B, C, H, W), jnp.float32)
    params = init_params(k_p, in_features=C * H * W)

    fwd = jax.jit(lambda a, b: barlow_twins_forward(
        params, a, b, lamb=lamb, batch_size=B))

    out = fwd(x1, x2)
    out = jax.tree_util.tree_map(jax.block_until_ready, out)

    assert all(bool(jnp.isfinite(v)) for v in out.values())
    print("KERNEL_OK")
</pallas_src>

<mosaic_0001>
module attributes {stable_mosaic.version = 11 : i64} {
  func.func @_fused_barlow_kernel(%arg0: memref<16x1024xbf16, #tpu.memory_space<vmem>>, %arg1: memref<1024x128xbf16, #tpu.memory_space<vmem>>, %arg2: memref<1x128xf32, #tpu.memory_space<vmem>>, %arg3: memref<128x128xbf16, #tpu.memory_space<vmem>>, %arg4: memref<1x128xf32, #tpu.memory_space<vmem>>, %arg5: memref<128x128xbf16, #tpu.memory_space<vmem>>, %arg6: memref<1x128xf32, #tpu.memory_space<vmem>>, %arg7: memref<4xf32, #tpu.memory_space<smem>>) attributes {dimension_semantics = [], scalar_prefetch = 0 : i64, scratch_operands = 0 : i64, tpu.core_type = #tpu.core_type<tc>} {
    %c0 = arith.constant 0 : index
    %c0_0 = arith.constant 0 : index
    %0 = vector.load %arg0[%c0, %c0_0] : memref<16x1024xbf16, #tpu.memory_space<vmem>>, vector<16x1024xbf16>
    %c0_1 = arith.constant 0 : index
    %c0_2 = arith.constant 0 : index
    %1 = vector.load %arg1[%c0_1, %c0_2] : memref<1024x128xbf16, #tpu.memory_space<vmem>>, vector<1024x128xbf16>
    %cst = arith.constant dense<0.000000e+00> : vector<16x128xf32>
    %2 = tpu.matmul %0, %1, %cst {dimension_numbers = #tpu.dot_dimension_numbers<[1], [0], [0], [1], [0, 0, 1, 1], [], []>} : vector<16x1024xbf16>, vector<1024x128xbf16>, vector<16x128xf32> -> vector<16x128xf32>
    %c0_3 = arith.constant 0 : index
    %c0_4 = arith.constant 0 : index
    %3 = vector.load %arg2[%c0_3, %c0_4] : memref<1x128xf32, #tpu.memory_space<vmem>>, vector<1x128xf32>
    %4 = vector.broadcast %3 : vector<1x128xf32> to vector<16x128xf32>
    %5 = arith.addf %2, %4 : vector<16x128xf32>
    %cst_5 = arith.constant 0.000000e+00 : f32
    %6 = vector.broadcast %cst_5 : f32 to vector<16x128xf32>
    %7 = arith.maximumf %5, %6 : vector<16x128xf32>
    %8 = arith.truncf %7 : vector<16x128xf32> to vector<16x128xbf16>
    %c0_6 = arith.constant 0 : index
    %c0_7 = arith.constant 0 : index
    %9 = vector.load %arg3[%c0_6, %c0_7] : memref<128x128xbf16, #tpu.memory_space<vmem>>, vector<128x128xbf16>
    %cst_8 = arith.constant dense<0.000000e+00> : vector<16x128xf32>
    %10 = tpu.matmul %8, %9, %cst_8 {dimension_numbers = #tpu.dot_dimension_numbers<[1], [0], [0], [1], [0, 0, 1, 1], [], []>} : vector<16x128xbf16>, vector<128x128xbf16>, vector<16x128xf32> -> vector<16x128xf32>
    %c0_9 = arith.constant 0 : index
    %c0_10 = arith.constant 0 : index
    %11 = vector.load %arg4[%c0_9, %c0_10] : memref<1x128xf32, #tpu.memory_space<vmem>>, vector<1x128xf32>
    %12 = vector.broadcast %11 : vector<1x128xf32> to vector<16x128xf32>
    %13 = arith.addf %10, %12 : vector<16x128xf32>
    %cst_11 = arith.constant 0.000000e+00 : f32
    %14 = vector.broadcast %cst_11 : f32 to vector<16x128xf32>
    %15 = arith.maximumf %13, %14 : vector<16x128xf32>
    %16 = arith.truncf %15 : vector<16x128xf32> to vector<16x128xbf16>
    %c0_12 = arith.constant 0 : index
    %c0_13 = arith.constant 0 : index
    %17 = vector.load %arg5[%c0_12, %c0_13] : memref<128x128xbf16, #tpu.memory_space<vmem>>, vector<128x128xbf16>
    %cst_14 = arith.constant dense<0.000000e+00> : vector<16x128xf32>
    %18 = tpu.matmul %16, %17, %cst_14 {dimension_numbers = #tpu.dot_dimension_numbers<[1], [0], [0], [1], [0, 0, 1, 1], [], []>} : vector<16x128xbf16>, vector<128x128xbf16>, vector<16x128xf32> -> vector<16x128xf32>
    %c0_15 = arith.constant 0 : index
    %c0_16 = arith.constant 0 : index
    %19 = vector.load %arg6[%c0_15, %c0_16] : memref<1x128xf32, #tpu.memory_space<vmem>>, vector<1x128xf32>
    %20 = vector.broadcast %19 : vector<1x128xf32> to vector<16x128xf32>
    %21 = arith.addf %18, %20 : vector<16x128xf32>
    %22 = vector.extract_strided_slice %21 {offsets = [0, 0], sizes = [8, 128], strides = [1, 1]} : vector<16x128xf32> to vector<8x128xf32>
    %23 = vector.extract_strided_slice %21 {offsets = [8, 0], sizes = [8, 128], strides = [1, 1]} : vector<16x128xf32> to vector<8x128xf32>
    %cst_17 = arith.constant dense<0.000000e+00> : vector<128xf32>
    %24 = vector.multi_reduction <add>, %22, %cst_17 [0] : vector<8x128xf32> to vector<128xf32>
    %25 = vector.shape_cast %24 : vector<128xf32> to vector<1x128xf32>
    %cst_18 = arith.constant 8.000000e+00 : f32
    %26 = vector.broadcast %cst_18 : f32 to vector<1x128xf32>
    %27 = arith.divf %25, %26 : vector<1x128xf32>
    %28 = vector.broadcast %27 : vector<1x128xf32> to vector<8x128xf32>
    %29 = arith.subf %22, %28 : vector<8x128xf32>
    %30 = arith.mulf %29, %29 : vector<8x128xf32>
    %cst_19 = arith.constant dense<0.000000e+00> : vector<128xf32>
    %31 = vector.multi_reduction <add>, %30, %cst_19 [0] : vector<8x128xf32> to vector<128xf32>
    %32 = vector.shape_cast %31 : vector<128xf32> to vector<1x128xf32>
    %cst_20 = arith.constant 8.000000e+00 : f32
    %33 = vector.broadcast %cst_20 : f32 to vector<1x128xf32>
    %34 = arith.divf %32, %33 : vector<1x128xf32>
    %cst_21 = arith.constant 9.99999974E-6 : f32
    %35 = vector.broadcast %cst_21 : f32 to vector<1x128xf32>
    %36 = arith.addf %34, %35 : vector<1x128xf32>
    %37 = math.rsqrt %36 : vector<1x128xf32>
    %cst_22 = arith.constant 1.250000e-01 : f32
    %38 = vector.broadcast %cst_22 : f32 to vector<1x128xf32>
    %39 = arith.mulf %37, %38 : vector<1x128xf32>
    %40 = vector.broadcast %39 : vector<1x128xf32> to vector<8x128xf32>
    %41 = arith.mulf %29, %40 : vector<8x128xf32>
    %cst_23 = arith.constant dense<0.000000e+00> : vector<128xf32>
    %42 = vector.multi_reduction <add>, %23, %cst_23 [0] : vector<8x128xf32> to vector<128xf32>
    %43 = vector.shape_cast %42 : vector<128xf32> to vector<1x128xf32>
    %cst_24 = arith.constant 8.000000e+00 : f32
    %44 = vector.broadcast %cst_24 : f32 to vector<1x128xf32>
    %45 = arith.divf %43, %44 : vector<1x128xf32>
    %46 = vector.broadcast %45 : vector<1x128xf32> to vector<8x128xf32>
    %47 = arith.subf %23, %46 : vector<8x128xf32>
    %48 = arith.mulf %47, %47 : vector<8x128xf32>
    %cst_25 = arith.constant dense<0.000000e+00> : vector<128xf32>
    %49 = vector.multi_reduction <add>, %48, %cst_25 [0] : vector<8x128xf32> to vector<128xf32>
    %50 = vector.shape_cast %49 : vector<128xf32> to vector<1x128xf32>
    %cst_26 = arith.constant 8.000000e+00 : f32
    %51 = vector.broadcast %cst_26 : f32 to vector<1x128xf32>
    %52 = arith.divf %50, %51 : vector<1x128xf32>
    %cst_27 = arith.constant 9.99999974E-6 : f32
    %53 = vector.broadcast %cst_27 : f32 to vector<1x128xf32>
    %54 = arith.addf %52, %53 : vector<1x128xf32>
    %55 = math.rsqrt %54 : vector<1x128xf32>
    %cst_28 = arith.constant 1.000000e+00 : f32
    %56 = vector.broadcast %cst_28 : f32 to vector<1x128xf32>
    %57 = arith.mulf %55, %56 : vector<1x128xf32>
    %58 = vector.broadcast %57 : vector<1x128xf32> to vector<8x128xf32>
    %59 = arith.mulf %47, %58 : vector<8x128xf32>
    %cst_29 = arith.constant dense<0.000000e+00> : vector<128x128xf32>
    %60 = tpu.matmul %41, %59, %cst_29 {dimension_numbers = #tpu.dot_dimension_numbers<[0], [0], [1], [1], [0, 1, 1, 1], [], []>} : vector<8x128xf32>, vector<8x128xf32>, vector<128x128xf32> -> vector<128x128xf32>
    %61 = tpu.iota {dimensions = array<i32: 0>} : vector<128x128xi32>
    %62 = tpu.iota {dimensions = array<i32: 1>} : vector<128x128xi32>
    %c32_i32 = arith.constant 32 : i32
    %63 = vector.broadcast %c32_i32 : i32 to vector<128x128xi32>
    %64 = arith.cmpi slt, %61, %63 : vector<128x128xi32>
    %c32_i32_30 = arith.constant 32 : i32
    %65 = vector.broadcast %c32_i32_30 : i32 to vector<128x128xi32>
    %66 = arith.cmpi slt, %62, %65 : vector<128x128xi32>
    %67 = arith.andi %64, %66 : vector<128x128xi1>
    %68 = arith.cmpi eq, %61, %62 : vector<128x128xi32>
    %69 = arith.andi %67, %68 : vector<128x128xi1>
    %cst_31 = arith.constant 1.000000e+00 : f32
    %70 = vector.broadcast %cst_31 : f32 to vector<128x128xf32>
    %71 = arith.subf %60, %70 : vector<128x128xf32>
    %cst_32 = arith.constant 1.000000e+00 : f32
    %72 = vector.broadcast %cst_32 : f32 to vector<128x128xf32>
    %73 = arith.subf %60, %72 : vector<128x128xf32>
    %74 = arith.mulf %71, %73 : vector<128x128xf32>
    %cst_33 = arith.constant 0.000000e+00 : f32
    %75 = vector.broadcast %cst_33 : f32 to vector<128x128xf32>
    %76 = arith.select %69, %74, %75 : vector<128x128xi1>, vector<128x128xf32>
    %77 = vector.shape_cast %76 : vector<128x128xf32> to vector<1x128x128xf32>
    %cst_34 = arith.constant dense<0.000000e+00> : vector<1xf32>
    %78 = vector.multi_reduction <add>, %77, %cst_34 [1, 2] : vector<1x128x128xf32> to vector<1xf32>
    %79 = vector.shape_cast %78 : vector<1xf32> to vector<1x1x1xf32>
    %80 = vector.extract %79[0, 0, 0] : f32 from vector<1x1x1xf32>
    %cst_35 = arith.constant dense<true> : vector<128x128xi1>
    %81 = arith.xori %68, %cst_35 : vector<128x128xi1>
    %82 = arith.andi %67, %81 : vector<128x128xi1>
    %83 = arith.mulf %60, %60 : vector<128x128xf32>
    %cst_36 = arith.constant 0.000000e+00 : f32
    %84 = vector.broadcast %cst_36 : f32 to vector<128x128xf32>
    %85 = arith.select %82, %83, %84 : vector<128x128xi1>, vector<128x128xf32>
    %86 = vector.shape_cast %85 : vector<128x128xf32> to vector<1x128x128xf32>
    %cst_37 = arith.constant dense<0.000000e+00> : vector<1xf32>
    %87 = vector.multi_reduction <add>, %86, %cst_37 [1, 2] : vector<1x128x128xf32> to vector<1xf32>
    %88 = vector.shape_cast %87 : vector<1xf32> to vector<1x1x1xf32>
    %89 = vector.extract %88[0, 0, 0] : f32 from vector<1x1x1xf32>
    %cst_38 = arith.constant 5.000000e-03 : f32
    %90 = arith.mulf %cst_38, %89 : f32
    %91 = arith.addf %80, %90 : f32
    %cst_39 = arith.constant 0.0310937501 : f32
    %92 = arith.mulf %cst_39, %80 : f32
    %cst_40 = arith.constant 5.04032278E-6 : f32
    %93 = arith.mulf %cst_40, %89 : f32
    %94 = arith.addf %92, %93 : f32
    %c0_41 = arith.constant 0 : index
    %95 = memref.load %arg7[%c0_41] : memref<4xf32, #tpu.memory_space<smem>>
    memref.store %91, %arg7[%c0_41] : memref<4xf32, #tpu.memory_space<smem>>
    %c1 = arith.constant 1 : index
    %96 = memref.load %arg7[%c1] : memref<4xf32, #tpu.memory_space<smem>>
    memref.store %94, %arg7[%c1] : memref<4xf32, #tpu.memory_space<smem>>
    %c2 = arith.constant 2 : index
    %97 = memref.load %arg7[%c2] : memref<4xf32, #tpu.memory_space<smem>>
    memref.store %80, %arg7[%c2] : memref<4xf32, #tpu.memory_space<smem>>
    %c3 = arith.constant 3 : index
    %98 = memref.load %arg7[%c3] : memref<4xf32, #tpu.memory_space<smem>>
    memref.store %89, %arg7[%c3] : memref<4xf32, #tpu.memory_space<smem>>
    return
  }
}

</mosaic_0001>

<bundles_post_ra>
// kernel: _lambda_.1
= control target key start
LH: loop header
LB: loop body
LE: loop exit
PB: predicated region body
PF: predicated region fallthrough
CT: control target
= control target key end

     0   :  { %s2343_s0 = inlined_call_operand.vmem [shape: bf16[16,1024], index: 0, kind: input, shape index: {}]   ;;  %s2344_s1 = inlined_call_operand.vmem [shape: bf16[1024,128], index: 1, kind: input, shape index: {}]   ;;  %s2345_s2 = inlined_call_operand.vmem [shape: f32[1,128], index: 2, kind: input, shape index: {}]   ;;  %s2346_s3 = inlined_call_operand.vmem [shape: bf16[128,128], index: 3, kind: input, shape index: {}]   ;;  %s2347_s4 = inlined_call_operand.vmem [shape: f32[1,128], index: 4, kind: input, shape index: {}]   ;;  %s2348_s5 = inlined_call_operand.vmem [shape: bf16[128,128], index: 5, kind: input, shape index: {}]   ;;  %s2349_s6 = inlined_call_operand.vmem [shape: f32[1,128], index: 6, kind: input, shape index: {}]   ;;  %s2350_s7 = inlined_call_operand.vmem [shape: f32[4], index: 7, kind: output, shape index: {}]  }
   0x1   :  { %v1849_v0 = vld [vmem:[%s2344_s1 + $0x78] sm:$0xff]   ;;  %v1853_v4 = vld [vmem:[%s2344_s1 + $0x70] sm:$0xff]   ;;  %v1857_v8 = vld [vmem:[%s2344_s1 + $0x68] sm:$0xff]  }
   0x2   :  { %v1850_v1 = vld [vmem:[%s2344_s1 + $0xf8] sm:$0xff]   ;;  %1650 = vmatprep.subr.bf16.mxu0 %v1849_v0  ;;  %v1854_v5 = vld [vmem:[%s2344_s1 + $0xf0] sm:$0xff]   ;;  %v1858_v9 = vld [vmem:[%s2344_s1 + $0xe8] sm:$0xff]  }
   0x3   :  { %v1851_v2 = vld [vmem:[%s2344_s1 + $0x38] sm:$0xff]   ;;  %1672 = vmatprep.subr.bf16.mxu1 %v1850_v1  ;;  %v1855_v6 = vld [vmem:[%s2344_s1 + $0x30] sm:$0xff]   ;;  %v1859_v10 = vld [vmem:[%s2344_s1 + $0x28] sm:$0xff]  }
   0x4   :  { %v1852_v3 = vld [vmem:[%s2344_s1 + $0xb8] sm:$0xff]   ;;  %1651 = vmatpush3.bf16.msra.mxu0 %v1851_v2  ;;  %v1856_v7 = vld [vmem:[%s2344_s1 + $0xb0] sm:$0xff]   ;;  %v1860_v11 = vld [vmem:[%s2344_s1 + $0xa8] sm:$0xff]  }
   0x5   :  { %1673 = vmatpush3.bf16.msra.mxu1 %v1852_v3  ;;  %1652 = vmatprep.subr.bf16.mxu0 %v1853_v4  ;;  %v1861_v12 = vld [vmem:[%s2344_s1 + $0x60] sm:$0xff]   ;;  %v1865_v16 = vld [vmem:[%s2344_s1 + $0x58] sm:$0xff]   ;;  %v1869_v20 = vld [vmem:[%s2344_s1 + $0x50] sm:$0xff]  }
   0x6   :  { %1674 = vmatprep.subr.bf16.mxu1 %v1854_v5  ;;  %v1862_v13 = vld [vmem:[%s2344_s1 + $0xe0] sm:$0xff]   ;;  %v1866_v17 = vld [vmem:[%s2344_s1 + $0xd8] sm:$0xff]   ;;  %v1870_v21 = vld [vmem:[%s2344_s1 + $0xd0] sm:$0xff]  }
   0x7   :  { %v1863_v14 = vld [vmem:[%s2344_s1 + $0x20] sm:$0xff]   ;;  %v1867_v18 = vld [vmem:[%s2344_s1 + $0x18] sm:$0xff]   ;;  %v1871_v22 = vld [vmem:[%s2344_s1 + $0x10] sm:$0xff]  }
   0x8   :  { %1653 = vmatpush3.bf16.msra.mxu0 %v1855_v6  ;;  %v1864_v15 = vld [vmem:[%s2344_s1 + $0xa0] sm:$0xff]   ;;  %v1868_v19 = vld [vmem:[%s2344_s1 + $0x98] sm:$0xff]   ;;  %v1872_v23 = vld [vmem:[%s2344_s1 + $0x90] sm:$0xff]  }
   0x9   :  { %1675 = vmatpush3.bf16.msra.mxu1 %v1856_v7  ;;  %1654 = vmatprep.subr.bf16.mxu0 %v1857_v8  ;;  %v1873_v24 = vld [vmem:[%s2344_s1 + $0x48] sm:$0xff]   ;;  %v1877_v28 = vld [vmem:[%s2344_s1 + $0x40] sm:$0xff]   ;;  %v1881_v40 = vld [vmem:[%s2344_s1 + $0x178] sm:$0xff]  }
   0xa   :  { %1676 = vmatprep.subr.bf16.mxu1 %v1858_v9  ;;  %v1874_v25 = vld [vmem:[%s2344_s1 + $0xc8] sm:$0xff]   ;;  %v1878_v29 = vld [vmem:[%s2344_s1 + $0xc0] sm:$0xff]   ;;  %v1882_v41 = vld [vmem:[%s2344_s1 + $0x1f8] sm:$0xff]  }
   0xb   :  { %v1875_v26 = vld [vmem:[%s2344_s1 + $0x8] sm:$0xff]   ;;  %v1879_v30 = vld [vmem:[%s2344_s1] sm:$0xff]   ;;  %v1883_v42 = vld [vmem:[%s2344_s1 + $0x138] sm:$0xff]  }
   0xc   :  { %1655 = vmatpush3.bf16.msra.mxu0 %v1859_v10  ;;  %v1876_v27 = vld [vmem:[%s2344_s1 + $0x88] sm:$0xff]   ;;  %v1880_v31 = vld [vmem:[%s2344_s1 + $0x80] sm:$0xff]   ;;  %v1884_v43 = vld [vmem:[%s2344_s1 + $0x1b8] sm:$0xff]  }
   0xd   :  { %1677 = vmatpush3.bf16.msra.mxu1 %v1860_v11  ;;  %1656 = vmatprep.subr.bf16.mxu0 %v1861_v12  ;;  %v28_v32 = vld [vmem:[%s2343_s0] sm:$0xff]  ;;  %v29_v34 = vld [vmem:[%s2343_s0 + $0x8] sm:$0xff]  ;;  %v1885_v44 = vld [vmem:[%s2344_s1 + $0x170] sm:$0xff]  }
   0xe   :  { %1678 = vmatprep.subr.bf16.mxu1 %v1862_v13  ;;  %v32_v33 = vld [vmem:[%s2343_s0 + $0x20] sm:$0xff]  ;;  %v33_v37 = vld [vmem:[%s2343_s0 + $0x28] sm:$0xff]  ;;  %v1886_v45 = vld [vmem:[%s2344_s1 + $0x1f0] sm:$0xff]  }
   0xf   :  { %v1528_v35 = vcombine.low %v28_v32, %v32_v33  ;;  %v1529_v36 = vcombine.high %v28_v32, %v32_v33  ;;  %v1530_v38 = vcombine.low %v29_v34, %v33_v37  ;;  %v1531_v39 = vcombine.high %v29_v34, %v33_v37  ;;  %v1887_v46 = vld [vmem:[%s2344_s1 + $0x130] sm:$0xff]   ;;  %v1889_v48 = vld [vmem:[%s2344_s1 + $0x168] sm:$0xff]   ;;  %v1893_v52 = vld [vmem:[%s2344_s1 + $0x160] sm:$0xff]  }
  0x10   :  { %1657 = vmatpush3.bf16.msra.mxu0 %v1863_v14  ;;  %v1888_v47 = vld [vmem:[%s2344_s1 + $0x1b0] sm:$0xff]   ;;  %v1890_v49 = vld [vmem:[%s2344_s1 + $0x1e8] sm:$0xff]   ;;  %v1894_v53 = vld [vmem:[%s2344_s1 + $0x1e0] sm:$0xff]  }
  0x11   :  { %1679 = vmatpush3.bf16.msra.mxu1 %v1864_v15  ;;  %1658 = vmatprep.subr.bf16.mxu0 %v1865_v16  ;;  %v1891_v50 = vld [vmem:[%s2344_s1 + $0x128] sm:$0xff]   ;;  %v1895_v54 = vld [vmem:[%s2344_s1 + $0x120] sm:$0xff]   ;;  %v1897_v56 = vld [vmem:[%s2344_s1 + $0x158] sm:$0xff]  }
  0x12   :  { %1680 = vmatprep.subr.bf16.mxu1 %v1866_v17  ;;  %627 = vmatprep.mubr.bf16.mxu0 %v1529_v36  ;;  %v1892_v51 = vld [vmem:[%s2344_s1 + $0x1a8] sm:$0xff]   ;;  %v1896_v55 = vld [vmem:[%s2344_s1 + $0x1a0] sm:$0xff]   ;;  %v1898_v57 = vld [vmem:[%s2344_s1 + $0x1d8] sm:$0xff]  }
  0x13   :  { %668 = vmatprep.mubr.bf16.mxu1 %v1531_v39  ;;  %v1899_v58 = vld [vmem:[%s2344_s1 + $0x118] sm:$0xff]   ;;  %v1901_v60 = vld [vmem:[%s2344_s1 + $0x150] sm:$0xff]   ;;  %v1905_v0 = vld [vmem:[%s2344_s1 + $0x148] sm:$0xff]  }
  0x14   :  { %1659 = vmatpush3.bf16.msra.mxu0 %v1867_v18  ;;  %v1900_v59 = vld [vmem:[%s2344_s1 + $0x198] sm:$0xff]   ;;  %v1902_v61 = vld [vmem:[%s2344_s1 + $0x1d0] sm:$0xff]   ;;  %v1906_v1 = vld [vmem:[%s2344_s1 + $0x1c8] sm:$0xff]  }
  0x15   :  { %1681 = vmatpush3.bf16.msra.mxu1 %v1868_v19  ;;  %1660 = vmatprep.subr.bf16.mxu0 %v1869_v20  ;;  %v1903_v62 = vld [vmem:[%s2344_s1 + $0x110] sm:$0xff]   ;;  %v1907_v2 = vld [vmem:[%s2344_s1 + $0x108] sm:$0xff]   ;;  %v1909_v4 = vld [vmem:[%s2344_s1 + $0x140] sm:$0xff]  }
  0x16   :  { %1682 = vmatprep.subr.bf16.mxu1 %v1870_v21  ;;  %v1904_v63 = vld [vmem:[%s2344_s1 + $0x190] sm:$0xff]   ;;  %v1908_v3 = vld [vmem:[%s2344_s1 + $0x188] sm:$0xff]   ;;  %v1910_v5 = vld [vmem:[%s2344_s1 + $0x1c0] sm:$0xff]  }
  0x17   :  { %v1911_v6 = vld [vmem:[%s2344_s1 + $0x100] sm:$0xff]   ;;  %v30_v8 = vld [vmem:[%s2343_s0 + $0x10] sm:$0xff]  ;;  %v31_v12 = vld [vmem:[%s2343_s0 + $0x18] sm:$0xff] }
  0x18   :  { %1661 = vmatpush3.bf16.msra.mxu0 %v1871_v22  ;;  %v1912_v7 = vld [vmem:[%s2344_s1 + $0x180] sm:$0xff]   ;;  %v34_v9 = vld [vmem:[%s2343_s0 + $0x30] sm:$0xff]  ;;  %v35_v13 = vld [vmem:[%s2343_s0 + $0x38] sm:$0xff] }
  0x19   :  { %1683 = vmatpush3.bf16.msra.mxu1 %v1872_v23  ;;  %1662 = vmatprep.subr.bf16.mxu0 %v1873_v24  ;;  %v1532_v10 = vcombine.low %v30_v8, %v34_v9  ;;  %v1533_v11 = vcombine.high %v30_v8, %v34_v9  ;;  %v1534_v14 = vcombine.low %v31_v12, %v35_v13 }
  0x1a   :  { %1684 = vmatprep.subr.bf16.mxu1 %v1874_v25  ;;  %v1535_v15 = vcombine.high %v31_v12, %v35_v13 }
  0x1c   :  { %1663 = vmatpush3.bf16.msra.mxu0 %v1875_v26 }
  0x1d   :  { %1685 = vmatpush3.bf16.msra.mxu1 %v1876_v27  ;;  %1664 = vmatprep.subr.bf16.mxu0 %v1877_v28 }
  0x1e   :  { %1686 = vmatprep.subr.bf16.mxu1 %v1878_v29 }
  0x20   :  { %1665 = vmatpush3.bf16.msra.mxu0 %v1879_v30 }
  0x21   :  { %1687 = vmatpush3.bf16.msra.mxu1 %v1880_v31  ;;  %1694 = vmatprep.subr.bf16.mxu0 %v1881_v40 }
  0x22   :  { %1716 = vmatprep.subr.bf16.mxu1 %v1882_v41 }
  0x23   :  { %628 = vmatmul.mubr.bf16.vlgmr.msra.gmra.mxu0 %v1528_v35 }
  0x24   :  { %669 = vmatmul.mubr.bf16.vlgmr.msra.gmra.mxu1 %v1530_v38  ;;  %1695 = vmatpush3.bf16.msra.mxu0 %v1883_v42 }
  0x25   :  { %1717 = vmatpush3.bf16.msra.mxu1 %v1884_v43  ;;  %1696 = vmatprep.subr.bf16.mxu0 %v1885_v44 }
  0x26   :  { %1718 = vmatprep.subr.bf16.mxu1 %v1886_v45  ;;  %709 = vmatprep.mubr.bf16.mxu0 %v1533_v11 }
  0x27   :  { %750 = vmatprep.mubr.bf16.mxu1 %v1535_v15 }
  0x28   :  { %1697 = vmatpush3.bf16.msra.mxu0 %v1887_v46 }
  0x29   :  { %1719 = vmatpush3.bf16.msra.mxu1 %v1888_v47  ;;  %1698 = vmatprep.subr.bf16.mxu0 %v1889_v48 }
  0x2a   :  { %1720 = vmatprep.subr.bf16.mxu1 %v1890_v49 }
  0x2c   :  { %1699 = vmatpush3.bf16.msra.mxu0 %v1891_v50 }
  0x2d   :  { %1721 = vmatpush3.bf16.msra.mxu1 %v1892_v51  ;;  %1700 = vmatprep.subr.bf16.mxu0 %v1893_v52 }
  0x2e   :  { %1722 = vmatprep.subr.bf16.mxu1 %v1894_v53 }
  0x30   :  { %1701 = vmatpush3.bf16.msra.mxu0 %v1895_v54 }
  0x31   :  { %1723 = vmatpush3.bf16.msra.mxu1 %v1896_v55  ;;  %1702 = vmatprep.subr.bf16.mxu0 %v1897_v56 }
  0x32   :  { %1724 = vmatprep.subr.bf16.mxu1 %v1898_v57 }
  0x34   :  { %1703 = vmatpush3.bf16.msra.mxu0 %v1899_v58 }
  0x35   :  { %1725 = vmatpush3.bf16.msra.mxu1 %v1900_v59  ;;  %1704 = vmatprep.subr.bf16.mxu0 %v1901_v60 }
  0x36   :  { %1726 = vmatprep.subr.bf16.mxu1 %v1902_v61 }
  0x38   :  { %1705 = vmatpush3.bf16.msra.mxu0 %v1903_v62 }
  0x39   :  { %1727 = vmatpush3.bf16.msra.mxu1 %v1904_v63  ;;  %1706 = vmatprep.subr.bf16.mxu0 %v1905_v0 }
  0x3a   :  { %1728 = vmatprep.subr.bf16.mxu1 %v1906_v1 }
  0x3c   :  { %1707 = vmatpush3.bf16.msra.mxu0 %v1907_v2 }
  0x3d   :  { %1729 = vmatpush3.bf16.msra.mxu1 %v1908_v3  ;;  %1708 = vmatprep.subr.bf16.mxu0 %v1909_v4 }
  0x3e   :  { %1730 = vmatprep.subr.bf16.mxu1 %v1910_v5 }
  0x40   :  { %1709 = vmatpush3.bf16.msra.mxu0 %v1911_v6 }
  0x41   :  { %1731 = vmatpush3.bf16.msra.mxu1 %v1912_v7 }
  0x43   :  { %710 = vmatmul.mubr.bf16.vlgmr.msra.gmra.mxu0 %v1532_v10 }
  0x44   :  { %751 = vmatmul.mubr.bf16.vlgmr.msra.gmra.mxu1 %v1534_v14 }
  0x45   :  { %12 = vsyncpa [#allocation3], 0  ;;  %v1913_v16 = vld [vmem:[%s2346_s3 + $0x38] sm:$0xff]   ;;  %v1947_v17 = vmov 0.0   ;;  %v1914_v18 = vld [vmem:[%s2346_s3 + $0x30] sm:$0xff]   ;;  %vm1948_vm0 = vmmov 0  }
  0x46   :  { %1773 = vmatprep.subr.bf16.mxu0 %v1947_v17  ;;  %1793 = vmatprep.subr.bf16.mxu1 %v1947_v17  ;;  %v1915_v19 = vld [vmem:[%s2346_s3 + $0x28] sm:$0xff]   ;;  %v1916_v20 = vld [vmem:[%s2346_s3 + $0x20] sm:$0xff]   ;;  %v1917_v21 = vld [vmem:[%s2346_s3 + $0x18] sm:$0xff]   ;;  %vm1061_vm1 = vcmask 64512   ;;  %vm1949_vm5 = vmmov 1   ;;  %s1518_s16 = sshll.u32 %s2350_s7, 4  ;;  %s1519_s16 = int_to_ptr.vmem [resolvable:$true] %s1518_s16 }
  0x47   :  { %1774 = vmatpush3.bf16.msra.mxu0 %v1913_v16  ;;  %v1918_v22 = vld [vmem:[%s2346_s3 + $0x10] sm:$0xff]   ;;  %v1919_v23 = vld [vmem:[%s2346_s3 + $0x8] sm:$0xff]   ;;  %v1920_v24 = vld [vmem:[%s2346_s3] sm:$0xff]   ;;  %1789 = vmatprep.mubr.msk.bf16.mxu0 %vm1948_vm0, %v1947_v17  ;;  %s1933_s23 = scalar_lea.vmem %s1519_s16, 16  ;;  %p1938_p1 = scmp.lt.s32.totalorder %s1519_s16, %s1519_s16 }
  0x48   :  { %1775 = vmatprep.subr.bf16.mxu0 %v1947_v17  ;;  %1809 = vmatprep.mubr.msk.bf16.mxu1 %vm1948_vm0, %v1947_v17  ;;  %v1921_v25 = vld [vmem:[%s2348_s5 + $0x38] sm:$0xff]   ;;  %v1922_v26 = vld [vmem:[%s2348_s5 + $0x30] sm:$0xff]   ;;  %v1923_v27 = vld [vmem:[%s2348_s5 + $0x28] sm:$0xff]   ;;  %p1934_p0 = scmp.ne.s32.totalorder %s1519_s16, %s1933_s23  ;;  %p1939_p2 = scmp.lt.s32.totalorder %s1933_s23, %s1933_s23 }
  0x49   :  { %1794 = vmatpush3.bf16.msra.mxu1 %v1921_v25  ;;  %v1924_v28 = vld [vmem:[%s2348_s5 + $0x20] sm:$0xff]   ;;  %v1925_v29 = vld [vmem:[%s2348_s5 + $0x18] sm:$0xff]   ;;  %v1926_v2 = vld [vmem:[%s2348_s5 + $0x10] sm:$0xff]  }
  0x4a   :  { %1795 = vmatprep.subr.bf16.mxu1 %v1947_v17  ;;  %v1527_v37 = vld [vmem:[%s2345_s2] ss:$0 sm:$0xff]  ;;  %v1927_v3 = vld [vmem:[%s2348_s5 + $0x8] sm:$0xff]   ;;  %p1940_p3 = por %p1939_p2, %p1938_p1 }
  0x4b   :  { %1776 = vmatpush3.bf16.msra.mxu0 %v1914_v18  ;;  %v1928_v4 = vld [vmem:[%s2348_s5] sm:$0xff]  }
  0x4c   :  { %1777 = vmatprep.subr.bf16.mxu0 %v1947_v17  ;;  %v1600_v5 = vld [vmem:[%s2347_s4] ss:$0 sm:$0xff]  ;;  %p1941_p4 = pnand %p1940_p3, %p1934_p0 }
  0x4d   :  { %1796 = vmatpush3.bf16.msra.mxu1 %v1922_v26  ;;  %v1609_v15 = vld [vmem:[%s2349_s6] ss:$0 sm:$0xff] }
  0x4e   :  { %1797 = vmatprep.subr.bf16.mxu1 %v1947_v17 }
  0x4f   :  { %1778 = vmatpush3.bf16.msra.mxu0 %v1915_v19 }
  0x50   :  { %1779 = vmatprep.subr.bf16.mxu0 %v1947_v17 }
  0x51   :  { %1798 = vmatpush3.bf16.msra.mxu1 %v1923_v27 }
  0x52   :  { %1799 = vmatprep.subr.bf16.mxu1 %v1947_v17 }
  0x53   :  { %1780 = vmatpush3.bf16.msra.mxu0 %v1916_v20 }
  0x54   :  { %1781 = vmatprep.subr.bf16.mxu0 %v1947_v17 }
  0x55   :  { %1800 = vmatpush3.bf16.msra.mxu1 %v1924_v28 }
  0x56   :  { %1801 = vmatprep.subr.bf16.mxu1 %v1947_v17 }
  0x57   :  { %1782 = vmatpush3.bf16.msra.mxu0 %v1917_v21 }
  0x58   :  { %1783 = vmatprep.subr.bf16.mxu0 %v1947_v17 }
  0x59   :  { %1802 = vmatpush3.bf16.msra.mxu1 %v1925_v29 }
  0x5a   :  { %1803 = vmatprep.subr.bf16.mxu1 %v1947_v17 }
  0x5b   :  { %1784 = vmatpush3.bf16.msra.mxu0 %v1918_v22 }
  0x5c   :  { %1785 = vmatprep.subr.bf16.mxu0 %v1947_v17 }
  0x5d   :  { %1804 = vmatpush3.bf16.msra.mxu1 %v1926_v2 }
  0x5e   :  { %1805 = vmatprep.subr.bf16.mxu1 %v1947_v17 }
  0x5f   :  { %1786 = vmatpush3.bf16.msra.mxu0 %v1919_v23 }
  0x60   :  { %1787 = vmatprep.subr.bf16.mxu0 %v1947_v17 }
  0x61   :  { %1806 = vmatpush3.bf16.msra.mxu1 %v1927_v3 }
  0x62   :  { %1807 = vmatprep.subr.bf16.mxu1 %v1947_v17 }
  0x63   :  { %1788 = vmatpush3.bf16.msra.mxu0 %v1920_v24 }
  0x65   :  { %1808 = vmatpush3.bf16.msra.mxu1 %v1928_v4 }
  0xe3   :  { %v1666_v30 = vpop.f32.mrf.mxu0 }
  0xe4   :  { %v1688_v31 = vpop.f32.mrf.mxu1 }
  0xe5   :  { %v1667_v32 = vpop.f32.mrf.mxu0 }
  0xe6   :  { %v1689_v33 = vpop.f32.mrf.mxu1  ;;  %v1668_v35 = vadd.f32 %v1667_v32, %v1666_v30 }
  0xe7   :  { %v1669_v34 = vpop.f32.mrf.mxu0  ;;  %v1690_v40 = vadd.f32 %v1689_v33, %v1688_v31 }
  0xe8   :  { %v1691_v36 = vpop.f32.mrf.mxu1  ;;  %v630_v39 = vadd.f32 %v1668_v35, %v1527_v37 }
  0xe9   :  { %v1670_v38 = vpop.f32.mrf.mxu0 }
  0xea   :  { %v1671_v41 = vadd.f32 %v1670_v38, %v1669_v34  ;;  %v1692_v42 = vpop.f32.mrf.mxu1  ;;  %v671_v46 = vadd.f32 %v1690_v40, %v630_v39 }
  0xeb   :  { %v1693_v51 = vadd.f32 %v1692_v42, %v1691_v36 }
  0xec   :  { %v633_v47 = vadd.f32 %v1671_v41, %v1527_v37 }
  0xee   :  { %v674_v55 = vadd.f32 %v1693_v51, %v633_v47 }
 0x103   :  { %v1710_v43 = vpop.f32.mrf.mxu0 }
 0x104   :  { %v1732_v44 = vpop.f32.mrf.mxu1 }
 0x105   :  { %v1711_v45 = vpop.f32.mrf.mxu0 }
 0x106   :  { %v1712_v48 = vadd.f32 %v1711_v45, %v1710_v43  ;;  %v1733_v49 = vpop.f32.mrf.mxu1 }
 0x107   :  { %v1713_v50 = vpop.f32.mrf.mxu0  ;;  %v1734_v56 = vadd.f32 %v1733_v49, %v1732_v44 }
 0x108   :  { %v712_v52 = vadd.f32 %v1712_v48, %v671_v46  ;;  %v1735_v53 = vpop.f32.mrf.mxu1 }
 0x109   :  { %v1714_v54 = vpop.f32.mrf.mxu0 }
 0x10a   :  { %v1715_v57 = vadd.f32 %v1714_v54, %v1713_v50  ;;  %v1736_v58 = vpop.f32.mrf.mxu1  ;;  %v753_v59 = vadd.f32 %v1734_v56, %v712_v52 }
 0x10b   :  { %v1737_v61 = vadd.f32 %v1736_v58, %v1735_v53 }
 0x10c   :  { %v715_v60 = vadd.f32 %v1715_v57, %v674_v55  ;;  %v759_v63 = vmax.f32 %v753_v59, 0.0 }
 0x10e   :  { %v756_v62 = vadd.f32 %v1737_v61, %v715_v60 }
 0x110   :  { %v760_v0 = vmax.f32 %v756_v62, 0.0 }
 0x112   :  { %v761_v1 = vpack.c.bf16 %v760_v0, %v759_v63 }
 0x114   :  { %1790 = vmatmul.mubr.bf16.vlgmr.msra.gmra.mxu0 %v761_v1 }
 0x1d4   :  { %v867_v6 = vpop.f32.mrf.mxu0 }
 0x1d5   :  { %v868_v8 = vadd.f32 %v1600_v5, %v867_v6 }
 0x1d6   :  { %v1791_v7 = vpop.f32.mrf.mxu0 }
 0x1d7   :  { %v874_v12 = vmax.f32 %v868_v8, 0.0 }
 0x1d8   :  { %v870_v9 = vpop.f32.mrf.mxu0 }
 0x1d9   :  { %v871_v10 = vadd.f32 %v1600_v5, %v870_v9 }
 0x1da   :  { %v1792_v11 = vpop.f32.mrf.mxu0 }
 0x1db   :  { %v875_v13 = vmax.f32 %v871_v10, 0.0 }
 0x1dd   :  { %v876_v14 = vpack.c.bf16 %v875_v13, %v874_v12  ;;  %v1255_v13 = vlaneseq }
 0x1df   :  { %1810 = vmatmul.mubr.bf16.vlgmr.msra.gmra.mxu1 %v876_v14  ;;  %v1256_v14 = vshrl.u32 %v1255_v13, 7 }
 0x29f   :  { %v982_v16 = vpop.f32.mrf.mxu1 }
 0x2a0   :  { %v983_v17 = vadd.f32 %v1609_v15, %v982_v16  ;;  %v1273_v16 = vand.u32 127, %v1255_v13 }
 0x2a1   :  { %v1811_v18 = vpop.f32.mrf.mxu1 }
 0x2a2   :  { %v989_v19 = vrot.slane %v983_v17, 4  ;;  %vm1307_vm3 = vcmp.eq.s32.totalorder %v1256_v14, %v1273_v16  ;;  %v1258_v18 = vadd.s32 16, %v1256_v14  ;;  %vm1290_vm4 = vcmp.lt.s32.totalorder %v1273_v16, 32 }
 0x2a3   :  { %v985_v20 = vpop.f32.mrf.mxu1  ;;  %vm1411_vm7 = vmxor %vm1307_vm3, %vm1949_vm5 }
 0x2a4   :  { %v990_v21 = vadd.f32 %v989_v19, %v983_v17  ;;  %v986_v22 = vadd.f32 %v1609_v15, %v985_v20  ;;  %v1257_v15 = vadd.s32 8, %v1256_v14  ;;  %v1259_v19 = vadd.s32 24, %v1256_v14  ;;  %vm2307_vm10 = vmand %vm1290_vm4, %vm1307_vm3 }
 0x2a5   :  { %v1812_v23 = vpop.f32.mrf.mxu1  ;;  %vm1309_vm9 = vcmp.eq.s32.totalorder %v1258_v18, %v1273_v16  ;;  %vm2312_vm12 = vmand %vm1290_vm4, %vm1411_vm7 }
 0x2a6   :  { %v991_v24 = vrot.slane %v990_v21, 2  ;;  %v1010_v25 = vrot.slane %v986_v22, 4  ;;  %vm1308_vm2 = vcmp.eq.s32.totalorder %v1257_v15, %v1273_v16  ;;  %vm1310_vm11 = vcmp.eq.s32.totalorder %v1259_v19, %v1273_v16  ;;  %vm1413_vm13 = vmxor %vm1309_vm9, %vm1949_vm5 }
 0x2a7   :  { %vm1412_vm6 = vmxor %vm1308_vm2, %vm1949_vm5 }
 0x2a8   :  { %v1011_v26 = vadd.f32 %v1010_v25, %v986_v22  ;;  %v992_v27 = vadd.f32 %v991_v24, %v990_v21  ;;  %vm2302_vm8 = vmand %vm1290_vm4, %vm1412_vm6 }
 0x2a9   :  { %vm1414_vm14 = vmxor %vm1310_vm11, %vm1949_vm5 }
 0x2aa   :  { %v1012_v28 = vrot.slane %v1011_v26, 2  ;;  %v993_v29 = vrot.slane %v992_v27, 1  ;;  %vm2322_vm15 = vmand %vm1290_vm4, %vm1308_vm2 }
 0x2ab   :  { %vm1429_vm0 = vmand %vm1290_vm4, %vm1413_vm13 }
 0x2ac   :  { %v1013_v30 = vadd.f32 %v1012_v28, %v1011_v26  ;;  %v994_v31 = vadd.f32 %v993_v29, %v992_v27  ;;  %vm1325_vm2 = vmand %vm1290_vm4, %vm1309_vm9 }
 0x2ad   :  { %vm1326_vm3 = vmand %vm1290_vm4, %vm1310_vm11 }
 0x2ae   :  { %v1014_v32 = vrot.slane %v1013_v30, 1  ;;  %v996_v33 = vmul.f32 0.125, %v994_v31 }
 0x2b0   :  { %v1015_v34 = vadd.f32 %v1014_v32, %v1013_v30  ;;  %v997_v35 = vsub.f32 %v983_v17, %v996_v33 }
 0x2b2   :  { %v1016_v36 = vmul.f32 0.125, %v1015_v34  ;;  %v998_v37 = vmul.f32 %v997_v35, %v997_v35 }
 0x2b4   :  { %v1017_v38 = vsub.f32 %v986_v22, %v1016_v36  ;;  %v999_v39 = vrot.slane %v998_v37, 4 }
 0x2b6   :  { %v1018_v40 = vmul.f32 %v1017_v38, %v1017_v38  ;;  %v1000_v41 = vadd.f32 %v999_v39, %v998_v37 }
 0x2b8   :  { %v1019_v42 = vrot.slane %v1018_v40, 4  ;;  %v1001_v43 = vrot.slane %v1000_v41, 2 }
 0x2ba   :  { %v1020_v44 = vadd.f32 %v1019_v42, %v1018_v40  ;;  %v1002_v45 = vadd.f32 %v1001_v43, %v1000_v41 }
 0x2bc   :  { %v1021_v46 = vrot.slane %v1020_v44, 2  ;;  %v1003_v47 = vrot.slane %v1002_v45, 1 }
 0x2be   :  { %v1022_v48 = vadd.f32 %v1021_v46, %v1020_v44  ;;  %v1004_v49 = vadd.f32 %v1003_v47, %v1002_v45 }
 0x2c0   :  { %v1023_v50 = vrot.slane %v1022_v48, 1  ;;  %v1005_v51 = vmul.f32 0.125, %v1004_v49 }
 0x2c2   :  { %v1024_v52 = vadd.f32 %v1023_v50, %v1022_v48  ;;  %v1006_v53 = vadd.f32 1e-05, %v1005_v51 }
 0x2c4   :  { %v1025_v54 = vmul.f32 0.125, %v1024_v52  ;;  %1929 = vrsqrt.f32 %v1006_v53 }
 0x2c6   :  { %v1026_v55 = vadd.f32 1e-05, %v1025_v54 }
 0x2c8   :  { %1931 = vrsqrt.f32 %v1026_v55 }
 0x2d1   :  { %v1930_v56 = vpop.eup %1929 }
 0x2d2   :  { %v1008_v57 = vmul.f32 0.125, %v1930_v56 }
 0x2d4   :  { %v1009_v58 = vmul.f32 %v1008_v57, %v997_v35 }
 0x2d5   :  { %v1932_v59 = vpop.eup %1931 }
 0x2d6   :  { %v1028_v60 = vmul.f32 %v1932_v59, %v1017_v38  ;;  %1029 = vxpose.xlu0.b32.start.end [1/1] (short) %v1009_v58, 128 }
 0x2d8   :  { %1813 = vmatprep.subr.mxu0 %v1028_v60  ;;  %1839 = vmatprep.subr.mxu1 %v1028_v60 }
 0x2d9   :  { %1814 = vmatpush3.msra.mxu0 %v1028_v60  ;;  %1840 = vmatpush3.msra.mxu1 %v1028_v60 }
 0x352   :  { %v1045_v61 = vpop.trf.xlu0 }
 0x353   :  { %1815 = vmatprep.mubr.msk.f32.mxu0 %vm1061_vm1, %v1045_v61 }
 0x356   :  { %v1046_v62 = vpop.trf.xlu0 }
 0x357   :  { %1816 = vmatmul.mubr.msk.f32.vlgmr.msra.gmra.mxu0 %vm1061_vm1, %v1046_v62 }
 0x35a   :  { %v1047_v63 = vpop.trf.xlu0 }
 0x35b   :  { %1818 = vmatprep.mubr.msk.f32.mxu0 %vm1061_vm1, %v1047_v63 }
 0x35e   :  { %v1048_v0 = vpop.trf.xlu0 }
 0x35f   :  { %1819 = vmatmul.mubr.msk.f32.gmra.mxu0 %vm1061_vm1, %v1048_v0 }
 0x362   :  { %v1049_v1 = vpop.trf.xlu0 }
 0x363   :  { %1821 = vmatprep.mubr.msk.f32.mxu0 %vm1061_vm1, %v1049_v1 }
 0x366   :  { %v1050_v2 = vpop.trf.xlu0 }
 0x367   :  { %1822 = vmatmul.mubr.msk.f32.gmra.mxu0 %vm1061_vm1, %v1050_v2 }
 0x36a   :  { %v1051_v3 = vpop.trf.xlu0 }
 0x36b   :  { %1824 = vmatprep.mubr.msk.f32.mxu0 %vm1061_vm1, %v1051_v3 }
 0x36e   :  { %v1052_v4 = vpop.trf.xlu0 }
 0x36f   :  { %1825 = vmatmul.mubr.msk.f32.gmra.mxu0 %vm1061_vm1, %v1052_v4 }
 0x372   :  { %v1053_v5 = vpop.trf.xlu0 }
 0x373   :  { %1827 = vmatprep.mubr.msk.f32.mxu1 %vm1061_vm1, %v1053_v5 }
 0x376   :  { %v1054_v6 = vpop.trf.xlu0 }
 0x377   :  { %1828 = vmatmul.mubr.msk.f32.vlgmr.msra.gmra.mxu1 %vm1061_vm1, %v1054_v6 }
 0x37a   :  { %v1055_v7 = vpop.trf.xlu0 }
 0x37b   :  { %1830 = vmatprep.mubr.msk.f32.mxu1 %vm1061_vm1, %v1055_v7 }
 0x37e   :  { %v1056_v8 = vpop.trf.xlu0 }
 0x37f   :  { %1831 = vmatmul.mubr.msk.f32.gmra.mxu1 %vm1061_vm1, %v1056_v8 }
 0x382   :  { %v1057_v9 = vpop.trf.xlu0 }
 0x383   :  { %1833 = vmatprep.mubr.msk.f32.mxu1 %vm1061_vm1, %v1057_v9 }
 0x386   :  { %v1058_v10 = vpop.trf.xlu0 }
 0x387   :  { %1834 = vmatmul.mubr.msk.f32.gmra.mxu1 %vm1061_vm1, %v1058_v10 }
 0x38a   :  { %v1059_v11 = vpop.trf.xlu0 }
 0x38b   :  { %1836 = vmatprep.mubr.msk.f32.mxu1 %vm1061_vm1, %v1059_v11 }
 0x38e   :  { %v1060_v12 = vpop.trf.xlu0 }
 0x38f   :  { %1837 = vmatmul.mubr.msk.f32.gmra.mxu1 %vm1061_vm1, %v1060_v12  ;;  %vm1430_vm1 = vmand %vm1290_vm4, %vm1414_vm14 }
 0x417   :  { %v1817_v17 = vpop.f32.mrf.mxu0 }
 0x418   :  { %v1635_v23 = vadd.f32 -1.0, %v1817_v17  ;;  %v1444_v26 = vmul.f32 %v1817_v17, %v1817_v17 }
 0x419   :  { %v1176_v20 = vpop.f32.mrf.mxu0 }
 0x41a   :  { %v1634_v21 = vadd.f32 -1.0, %v1176_v20  ;;  %v1443_v25 = vmul.f32 %v1176_v20, %v1176_v20  ;;  %v1356_v31 = vmul.f32 %v1635_v23, %v1635_v23  ;;  %v1460_v34 = vsel %vm2302_vm8, %v1444_v26, 0.0 }
 0x41c   :  { %v1355_v28 = vmul.f32 %v1634_v21, %v1634_v21  ;;  %v1459_v32 = vsel %vm2312_vm12, %v1443_v25, 0.0  ;;  %v1372_v41 = vsel %vm2322_vm15, %v1356_v31, 0.0 }
 0x41d   :  { %v1475_v40 = vadd.f32 %v1460_v34, %v1459_v32 }
 0x41e   :  { %v1371_v36 = vsel %vm2307_vm10, %v1355_v28, 0.0 }
 0x41f   :  { %v1820_v29 = vpop.f32.mrf.mxu0  ;;  %v1387_v45 = vadd.f32 %v1372_v41, %v1371_v36 }
 0x420   :  { %v1637_v33 = vadd.f32 -1.0, %v1820_v29  ;;  %v1446_v37 = vmul.f32 %v1820_v29, %v1820_v29 }
 0x421   :  { %v1186_v35 = vpop.f32.mrf.mxu0 }
 0x422   :  { %v1636_v38 = vadd.f32 -1.0, %v1186_v35  ;;  %v1445_v39 = vmul.f32 %v1186_v35, %v1186_v35  ;;  %v1358_v42 = vmul.f32 %v1637_v33, %v1637_v33  ;;  %v1462_v48 = vsel %vm1430_vm1, %v1446_v37, 0.0 }
 0x424   :  { %v1357_v43 = vmul.f32 %v1636_v38, %v1636_v38  ;;  %v1461_v44 = vsel %vm1429_vm0, %v1445_v39, 0.0  ;;  %v1374_v52 = vsel %vm1326_vm3, %v1358_v42, 0.0 }
 0x425   :  { %v1476_v46 = vadd.f32 %v1475_v40, %v1461_v44 }
 0x426   :  { %v1373_v47 = vsel %vm1325_vm2, %v1357_v43, 0.0 }
 0x427   :  { %v1477_v49 = vadd.f32 %v1476_v46, %v1462_v48  ;;  %v1388_v50 = vadd.f32 %v1387_v45, %v1373_v47  ;;  %v1823_v51 = vpop.f32.mrf.mxu0 }
 0x429   :  { %1490 = vadd.xlane.f32.xlu1 %v1477_v49  ;;  %v1389_v53 = vadd.f32 %v1388_v50, %v1374_v52  ;;  %v1196_v54 = vpop.f32.mrf.mxu0 }
 0x42b   :  { %1402 = vadd.xlane.f32.xlu0 %v1389_v53 }
 0x42f   :  { %v1826_v55 = vpop.f32.mrf.mxu0 }
 0x431   :  { %v1206_v56 = vpop.f32.mrf.mxu0 }
 0x437   :  { %v1829_v57 = vpop.f32.mrf.mxu1 }
 0x439   :  { %v1216_v58 = vpop.f32.mrf.mxu1 }
 0x43f   :  { %v1832_v59 = vpop.f32.mrf.mxu1 }
 0x441   :  { %v1226_v60 = vpop.f32.mrf.mxu1 }
 0x447   :  { %v1835_v61 = vpop.f32.mrf.mxu1 }
 0x449   :  { %v1236_v62 = vpop.f32.mrf.mxu1 }
 0x44f   :  { %v1838_v63 = vpop.f32.mrf.mxu1 }
 0x451   :  { %v1246_v0 = vpop.f32.mrf.mxu1 }
 0x4b2   :  { %v1491_v1 = vpop.xlane.xlu1 %1490 }
 0x4b3   :  { %v1492_v2 = vrot.slane %v1491_v1, 4 }
 0x4b4   :  { %v1403_v3 = vpop.xlane.xlu0 %1402 }
 0x4b5   :  { %v1493_v4 = vadd.f32 %v1492_v2, %v1491_v1  ;;  %v1404_v5 = vrot.slane %v1403_v3, 4 }
 0x4b7   :  { %v1494_v6 = vrot.slane %v1493_v4, 2  ;;  %v1405_v7 = vadd.f32 %v1404_v5, %v1403_v3 }
 0x4b9   :  { %v1495_v8 = vadd.f32 %v1494_v6, %v1493_v4  ;;  %v1406_v9 = vrot.slane %v1405_v7, 2 }
 0x4bb   :  { %v1407_v10 = vadd.f32 %v1406_v9, %v1405_v7  ;;  %v1496_v11 = vrot.slane %v1495_v8, 1 }
 0x4bd   :  { %v1408_v12 = vrot.slane %v1407_v10, 1  ;;  %v1497_v14 = vadd.f32 %v1496_v11, %v1495_v8 }
 0x4bf   :  { %v1409_v13 = vadd.f32 %v1408_v12, %v1407_v10 }
 0x4c1   :  { %1841 = vpush %v1409_v13 }
 0x4c2   :  { %1843 = vpush %v1497_v14 }
 0x4f2   :  { %s1842_s4 = spop %1841 }
 0x4f3   :  { %1509 = sst [smem:[#allocation2 + $0x2]] %s1842_s4  ;;  %s1501_s17 = smul.f32 0.03109375, %s1842_s4 }
 0x4f4   :  { %s1844_s18 = spop %1843 }
 0x4f5   :  { %s1499_s19 = smul.f32 0.005, %s1844_s18  ;;  %1511 = sst [smem:[#allocation2 + $0x3]] %s1844_s18 }
 0x4f6   :  { %s1502_s20 = smul.f32 5.040323e-06, %s1844_s18 }
 0x4f7   :  { %s1500_s21 = sadd.f32 %s1842_s4, %s1499_s19 }
 0x4f8   :  { %s1503_s22 = sadd.f32 %s1502_s20, %s1501_s17 }
 0x4f9   :  { %1505 = sst [smem:[#allocation2]] %s1500_s21 }
 0x4fa   :  { %1507 = sst [smem:[#allocation2 + $0x1]] %s1503_s22 }
 0x4fb   :  { %1944 = shalt.err (!%p1941_p4)
}
 0x4fc   :  { %s1950_s24 = smov [#allocation2]  }
 0x4fd   :  { %1521 = dma.smem_to_vmem %s1950_s24, 16, %s1519_s16, [#allocation3]  }
 0x4fe   :  { %1945 = dma.done.wait [#allocation3], 16  }
 0x4ff   :  { %1946 = vsyncadd [#allocation3], 4294967280 }
 0x500   :  { %1525 = sfence }
 0x501   :  { %1526 = vsyncpa [#allocation3], 1 }

</bundles_post_ra>
